<compile_context>
chip_gen: v7x
topology: tpu7x:2x2x1
jax: 0.10.0
libtpu: 0.0.40
codegen_flags: <defaults>
</compile_context>

<pallas_src>
import jax
import jax.numpy as jnp
from jax.experimental import pallas as pl
from jax.experimental.pallas import tpu as pltpu

_H1 = 64   # fc1 output features
_H2 = 32   # fc2 output features


def _round_up(x, m):
    return (x + m - 1) // m * m


# --------------------------------------------------------------------------
# Kernel
# --------------------------------------------------------------------------
def _mlp_wc_kernel(x_ref, w1_ref, b1_ref, w2_ref, b2_ref, w3_ref, b3_ref,
                   o_ref, acc_ref):
    """One (batch-tile, K-tile) grid step.

    x_ref  : (TILE_B, TILE_K) f32   activations (cast to bf16 in-kernel)
    w1_ref : (TILE_K, 64)     bf16  fc1 weights (zero padded along K)
    b1_ref : (1, 64)          f32   fc1 bias
    w2_ref : (64, 32)         bf16  fc2 weights
    b2_ref : (1, 32)          f32   fc2 bias
    w3_ref : (32, C_pad)      bf16  fc3 weights (zero padded classes)
    b3_ref : (1, C_pad)       f32   fc3 bias; padded classes carry -1e30
    o_ref  : (TILE_B, C_pad)  f32   softmax output
    acc_ref: (TILE_B, 64)     f32   fc1 accumulator, resident across K axis
    """
    k = pl.program_id(1)
    cd = w1_ref.dtype

    @pl.when(k == 0)
    def _init():
        acc_ref[...] = jnp.zeros_like(acc_ref)

    # fc1 partial product; bf16 MXU inputs, f32 accumulation.
    acc_ref[...] += jnp.dot(x_ref[...].astype(cd), w1_ref[...],
                            preferred_element_type=jnp.float32)

    @pl.when(k == pl.num_programs(1) - 1)
    def _finalize():
        # fc1 bias + ReLU (only after the full K sum).
        h1 = jnp.maximum(acc_ref[...] + b1_ref[...], 0.0)

        # fc2 + ReLU
        h2 = jnp.dot(h1.astype(cd), w2_ref[...],
                     preferred_element_type=jnp.float32) + b2_ref[...]
        h2 = jnp.maximum(h2, 0.0)

        # fc3
        logits = jnp.dot(h2.astype(cd), w3_ref[...],
                         preferred_element_type=jnp.float32) + b3_ref[...]

        # Numerically stable softmax over the class axis (exact divide: this
        # runs once per batch tile, and approx reciprocal broke sum==1).
        m = jnp.max(logits, axis=-1, keepdims=True)
        e = jnp.exp(logits - m)
        s = jnp.sum(e, axis=-1, keepdims=True)
        o_ref[...] = (e / s).astype(o_ref.dtype)


# --------------------------------------------------------------------------
# One-time parameter packing (amortized across calls)
# --------------------------------------------------------------------------
def pack_params(params, *, compute_dtype=jnp.bfloat16, max_tile_k=8192):
    """Pack/pad the weights once. Returns a dict reused by every forward."""
    K = params["w1"].shape[0]
    C = params["w3"].shape[1]
    cd = compute_dtype

    # K-tiling decided here (static per model): full-K single step when it
    # fits, otherwise 8192-wide (multiple of 128) tiles with zero padding.
    if K <= max_tile_k:
        tile_k, k_pad = K, K
    else:
        tile_k = max_tile_k
        k_pad = _round_up(K, tile_k)

    c_pad = _round_up(max(C, 1), 128)          # lane-dense output stores

    w1 = jnp.zeros((k_pad, _H1), cd).at[:K, :].set(params["w1"].astype(cd))
    b1 = params["b1"].astype(jnp.float32).reshape(1, _H1)
    w2 = params["w2"].astype(cd)
    b2 = params["b2"].astype(jnp.float32).reshape(1, _H2)
    w3 = jnp.zeros((_H2, c_pad), cd).at[:, :C].set(params["w3"].astype(cd))
    b3 = jnp.full((1, c_pad), -1e30, jnp.float32)   # mask padded classes
    b3 = b3.at[0, :C].set(params["b3"].astype(jnp.float32))

    return {"w1": w1, "b1": b1, "w2": w2, "b2": b2, "w3": w3, "b3": b3,
            "K": K, "C": C, "tile_k": tile_k, "k_pad": k_pad, "c_pad": c_pad}


def _pick_tile_b(B, max_tile_b):
    if B > max_tile_b:
        return max_tile_b
    if B >= 16 and B % 16 == 0:
        # >= 2 batch tiles without padding -> v7x's two TCs can both work
        # (neutral on v5e/v6e).
        return B // 2
    return B   # single full-dim tile, no batch padding


# --------------------------------------------------------------------------
# Forward wrappers
# --------------------------------------------------------------------------
def mlp_wc_forward_batched(x, packed, *, max_tile_b=256):
    """Batched MLP_wc forward. x: (B, 2*input_size) f32 -> (B, C) probs."""
    B, K = x.shape
    assert K == packed["K"], "x feature dim does not match packed params"
    tile_k, k_pad = packed["tile_k"], packed["k_pad"]
    c_pad, C = packed["c_pad"], packed["C"]

    tile_b = _pick_tile_b(B, max_tile_b)
    b_pad = _round_up(B, tile_b)

    if b_pad != B or k_pad != K:
        # Only materialize a padded copy when the tiling truly requires it.
        x_in = jnp.zeros((b_pad, k_pad), x.dtype).at[:B, :K].set(x)
    else:
        x_in = x   # stream the dominant operand straight from HBM

    grid = (b_pad // tile_b, k_pad // tile_k)

    out = pl.pallas_call(
        _mlp_wc_kernel,
        out_shape=jax.ShapeDtypeStruct((b_pad, c_pad), jnp.float32),
        grid_spec=pltpu.PrefetchScalarGridSpec(
            num_scalar_prefetch=0,
            grid=grid,
            in_specs=[
                pl.BlockSpec((tile_b, tile_k), lambda i, k: (i, k)),   # x
                pl.BlockSpec((tile_k, _H1), lambda i, k: (k, 0)),      # w1
                pl.BlockSpec((1, _H1), lambda i, k: (0, 0)),           # b1
                pl.BlockSpec((_H1, _H2), lambda i, k: (0, 0)),         # w2
                pl.BlockSpec((1, _H2), lambda i, k: (0, 0)),           # b2
                pl.BlockSpec((_H2, c_pad), lambda i, k: (0, 0)),       # w3
                pl.BlockSpec((1, c_pad), lambda i, k: (0, 0)),         # b3
            ],
            out_specs=pl.BlockSpec((tile_b, c_pad), lambda i, k: (i, 0)),
            scratch_shapes=[pltpu.VMEM((tile_b, _H1), jnp.float32)],
        ),
        compiler_params=pltpu.CompilerParams(
            dimension_semantics=("parallel", "arbitrary")),
    )(x_in, packed["w1"], packed["b1"], packed["w2"], packed["b2"],
      packed["w3"], packed["b3"])

    return out[:B, :C]


def mlp_wc_forward(embedding, packed):
    """Matches MLP_wc.forward: embedding.view(1, -1) -> softmax probs (1, C)."""
    x = jnp.reshape(embedding, (1, -1)).astype(jnp.float32)
    return mlp_wc_forward_batched(x, packed)


# --------------------------------------------------------------------------
# Parameter init + references
# --------------------------------------------------------------------------
def init_params(input_size, class_size=2, seed=0):
    """Deterministic synthetic init (same shapes as the nn.Linear layers)."""
    key = jax.random.PRNGKey(seed)
    k1, k2, k3, k4, k5, k6 = jax.random.split(key, 6)
    in1 = input_size * 2
    s1 = 1.0 / jnp.sqrt(in1)
    s2 = 1.0 / jnp.sqrt(64.0)
    s3 = 1.0 / jnp.sqrt(32.0)
    return {
        # stored as (in_features, out_features)
        "w1": jax.random.uniform(k1, (in1, _H1), jnp.float32, -s1, s1),
        "b1": jax.random.uniform(k2, (_H1,), jnp.float32, -s1, s1),
        "w2": jax.random.uniform(k3, (_H1, _H2), jnp.float32, -s2, s2),
        "b2": jax.random.uniform(k4, (_H2,), jnp.float32, -s2, s2),
        "w3": jax.random.uniform(k5, (_H2, class_size), jnp.float32, -s3, s3),
        "b3": jax.random.uniform(k6, (class_size,), jnp.float32, -s3, s3),
    }


def _reference_forward_bf16(x, params, compute_dtype=jnp.bfloat16):
    """Pure-JAX reference mirroring the kernel's bf16-matmul / f32-bias math."""
    cd = compute_dtype

    def dense(h, w, b):
        return (jnp.dot(h.astype(cd), w.astype(cd),
                        preferred_element_type=jnp.float32)
                + b.astype(jnp.float32))

    h1 = jnp.maximum(dense(x, params["w1"], params["b1"]), 0.0)
    h2 = jnp.maximum(dense(h1, params["w2"], params["b2"]), 0.0)
    logits = dense(h2, params["w3"], params["b3"])
    return jax.nn.softmax(logits, axis=-1)


def _reference_forward_f32(x, params):
    """Exact f32 reference (original PyTorch semantics)."""
    h1 = jnp.maximum(x @ params["w1"] + params["b1"], 0.0)
    h2 = jnp.maximum(h1 @ params["w2"] + params["b2"], 0.0)
    logits = h2 @ params["w3"] + params["b3"]
    return jax.nn.softmax(logits, axis=-1)


# --------------------------------------------------------------------------
if __name__ == "__main__":
    input_size = 32
    class_size = 2

    key = jax.random.PRNGKey(0)
    k_emb, k_batch = jax.random.split(key)
    # Two concatenated word-content vectors -> view(1, -1) gives (1, 64).
    embedding = jax.random.normal(k_emb, (2, input_size), dtype=jnp.float32)

    params = init_params(input_size, class_size, seed=0)
    packed = pack_params(params)          # one-time weight packing

    # --- single-example path: exactly the module's forward semantics -----
    z = jax.block_until_ready(mlp_wc_forward(embedding, packed))
    assert z.shape == (1, class_size)

    x1 = jnp.reshape(embedding, (1, -1)).astype(jnp.float32)
    z_ref = _reference_forward_bf16(x1, params)       # bf16-matched reference
    z_f32 = _reference_forward_f32(x1, params)        # exact f32 reference
    assert jnp.allclose(z, z_ref, atol=5e-3), (z, z_ref)
    assert jnp.allclose(z, z_f32, atol=5e-2), (z, z_f32)
    assert jnp.allclose(jnp.sum(z, axis=1), 1.0, atol=1e-3)

    # --- batched path: amortizes launch/DMA overhead, same per-row math ---
    xb = jax.random.normal(k_batch, (16, 2 * input_size), dtype=jnp.float32)
    zb = jax.block_until_ready(mlp_wc_forward_batched(xb, packed))
    zb_ref = _reference_forward_bf16(xb, params)
    zb_f32 = _reference_forward_f32(xb, params)
    assert zb.shape == (16, class_size)
    assert jnp.allclose(zb, zb_ref, atol=5e-3), (zb, zb_ref)
    assert jnp.allclose(zb, zb_f32, atol=5e-2), (zb, zb_f32)
    assert jnp.allclose(jnp.sum(zb, axis=1), 1.0, atol=1e-3)

    print("KERNEL_OK")
</pallas_src>

<mosaic_0001>
module attributes {stable_mosaic.version = 11 : i64} {
  func.func @_mlp_wc_kernel(%arg0: i32, %arg1: i32, %arg2: memref<1x64xf32, #tpu.memory_space<vmem>>, %arg3: memref<64x64xbf16, #tpu.memory_space<vmem>>, %arg4: memref<1x64xf32, #tpu.memory_space<vmem>>, %arg5: memref<64x32xbf16, #tpu.memory_space<vmem>>, %arg6: memref<1x32xf32, #tpu.memory_space<vmem>>, %arg7: memref<32x128xbf16, #tpu.memory_space<vmem>>, %arg8: memref<1x128xf32, #tpu.memory_space<vmem>>, %arg9: memref<1x128xf32, #tpu.memory_space<vmem>>, %arg10: memref<1x64xf32, #tpu.memory_space<vmem>>) attributes {dimension_semantics = [#tpu.dimension_semantics<parallel>, #tpu.dimension_semantics<arbitrary>], iteration_bounds = array<i64: 1, 1>, scalar_prefetch = 0 : i64, scratch_operands = 1 : i64, tpu.core_type = #tpu.core_type<tc>, window_params = [{transform_indices = @transform_0, window_bounds = array<i64: 1, 64>}, {transform_indices = @transform_1, window_bounds = array<i64: 64, 64>}, {pipeline_mode = #tpu.pipeline_mode<synchronous>, transform_indices = @transform_2, window_bounds = array<i64: 1, 64>}, {pipeline_mode = #tpu.pipeline_mode<synchronous>, transform_indices = @transform_3, window_bounds = array<i64: 64, 32>}, {pipeline_mode = #tpu.pipeline_mode<synchronous>, transform_indices = @transform_4, window_bounds = array<i64: 1, 32>}, {pipeline_mode = #tpu.pipeline_mode<synchronous>, transform_indices = @transform_5, window_bounds = array<i64: 32, 128>}, {pipeline_mode = #tpu.pipeline_mode<synchronous>, transform_indices = @transform_6, window_bounds = array<i64: 1, 128>}, {transform_indices = @transform_7, window_bounds = array<i64: 1, 128>}]} {
    %c0_i32 = arith.constant 0 : i32
    %0 = arith.cmpi eq, %arg1, %c0_i32 : i32
    %1 = arith.extui %0 : i1 to i32
    %c0_i32_0 = arith.constant 0 : i32
    %2 = arith.cmpi ne, %1, %c0_i32_0 : i32
    scf.if %2 {
      %cst_10 = arith.constant 0.000000e+00 : f32
      %13 = vector.broadcast %cst_10 : f32 to vector<1x64xf32>
      %c0_11 = arith.constant 0 : index
      %c0_12 = arith.constant 0 : index
      %14 = vector.load %arg10[%c0_11, %c0_12] : memref<1x64xf32, #tpu.memory_space<vmem>>, vector<1x64xf32>
      tpu.vector_store %arg10[%c0_11, %c0_12], %13 {strides = array<i32>} : memref<1x64xf32, #tpu.memory_space<vmem>>, vector<1x64xf32>,
    } else {
    }
    %c0 = arith.constant 0 : index
    %c0_1 = arith.constant 0 : index
    %3 = vector.load %arg10[%c0, %c0_1] : memref<1x64xf32, #tpu.memory_space<vmem>>, vector<1x64xf32>
    %c0_2 = arith.constant 0 : index
    %c0_3 = arith.constant 0 : index
    %4 = vector.load %arg2[%c0_2, %c0_3] : memref<1x64xf32, #tpu.memory_space<vmem>>, vector<1x64xf32>
    %5 = arith.truncf %4 : vector<1x64xf32> to vector<1x64xbf16>
    %c0_4 = arith.constant 0 : index
    %c0_5 = arith.constant 0 : index
    %6 = vector.load %arg3[%c0_4, %c0_5] : memref<64x64xbf16, #tpu.memory_space<vmem>>, vector<64x64xbf16>
    %cst = arith.constant dense<0.000000e+00> : vector<1x64xf32>
    %7 = tpu.matmul %5, %6, %cst {dimension_numbers = #tpu.dot_dimension_numbers<[1], [0], [0], [1], [0, 0, 1, 1], [], []>} : vector<1x64xbf16>, vector<64x64xbf16>, vector<1x64xf32> -> vector<1x64xf32>
    %8 = arith.addf %3, %7 : vector<1x64xf32>
    %c0_6 = arith.constant 0 : index
    %c0_7 = arith.constant 0 : index
    %9 = vector.load %arg10[%c0_6, %c0_7] : memref<1x64xf32, #tpu.memory_space<vmem>>, vector<1x64xf32>
    tpu.vector_store %arg10[%c0_6, %c0_7], %8 {strides = array<i32>} : memref<1x64xf32, #tpu.memory_space<vmem>>, vector<1x64xf32>,
    %c0_i32_8 = arith.constant 0 : i32
    %10 = arith.cmpi eq, %arg1, %c0_i32_8 : i32
    %11 = arith.extui %10 : i1 to i32
    %c0_i32_9 = arith.constant 0 : i32
    %12 = arith.cmpi ne, %11, %c0_i32_9 : i32
    scf.if %12 {
      %c0_10 = arith.constant 0 : index
      %c0_11 = arith.constant 0 : index
      %13 = vector.load %arg10[%c0_10, %c0_11] : memref<1x64xf32, #tpu.memory_space<vmem>>, vector<1x64xf32>
      %c0_12 = arith.constant 0 : index
      %c0_13 = arith.constant 0 : index
      %14 = vector.load %arg4[%c0_12, %c0_13] : memref<1x64xf32, #tpu.memory_space<vmem>>, vector<1x64xf32>
      %15 = arith.addf %13, %14 : vector<1x64xf32>
      %cst_14 = arith.constant 0.000000e+00 : f32
      %16 = vector.broadcast %cst_14 : f32 to vector<1x64xf32>
      %17 = arith.maximumf %15, %16 : vector<1x64xf32>
      %18 = arith.truncf %17 : vector<1x64xf32> to vector<1x64xbf16>
      %c0_15 = arith.constant 0 : index
      %c0_16 = arith.constant 0 : index
      %19 = vector.load %arg5[%c0_15, %c0_16] : memref<64x32xbf16, #tpu.memory_space<vmem>>, vector<64x32xbf16>
      %cst_17 = arith.constant dense<0.000000e+00> : vector<1x32xf32>
      %20 = tpu.matmul %18, %19, %cst_17 {dimension_numbers = #tpu.dot_dimension_numbers<[1], [0], [0], [1], [0, 0, 1, 1], [], []>} : vector<1x64xbf16>, vector<64x32xbf16>, vector<1x32xf32> -> vector<1x32xf32>
      %c0_18 = arith.constant 0 : index
      %c0_19 = arith.constant 0 : index
      %21 = vector.load %arg6[%c0_18, %c0_19] : memref<1x32xf32, #tpu.memory_space<vmem>>, vector<1x32xf32>
      %22 = arith.addf %20, %21 : vector<1x32xf32>
      %cst_20 = arith.constant 0.000000e+00 : f32
      %23 = vector.broadcast %cst_20 : f32 to vector<1x32xf32>
      %24 = arith.maximumf %22, %23 : vector<1x32xf32>
      %25 = arith.truncf %24 : vector<1x32xf32> to vector<1x32xbf16>
      %c0_21 = arith.constant 0 : index
      %c0_22 = arith.constant 0 : index
      %26 = vector.load %arg7[%c0_21, %c0_22] : memref<32x128xbf16, #tpu.memory_space<vmem>>, vector<32x128xbf16>
      %cst_23 = arith.constant dense<0.000000e+00> : vector<1x128xf32>
      %27 = tpu.matmul %25, %26, %cst_23 {dimension_numbers = #tpu.dot_dimension_numbers<[1], [0], [0], [1], [0, 0, 1, 1], [], []>} : vector<1x32xbf16>, vector<32x128xbf16>, vector<1x128xf32> -> vector<1x128xf32>
      %c0_24 = arith.constant 0 : index
      %c0_25 = arith.constant 0 : index
      %28 = vector.load %arg8[%c0_24, %c0_25] : memref<1x128xf32, #tpu.memory_space<vmem>>, vector<1x128xf32>
      %29 = arith.addf %27, %28 : vector<1x128xf32>
      %cst_26 = arith.constant dense<0xFF800000> : vector<1xf32>
      %30 = vector.multi_reduction <maximumf>, %29, %cst_26 [1] : vector<1x128xf32> to vector<1xf32>
      %31 = vector.shape_cast %30 : vector<1xf32> to vector<1x1xf32>
      %32 = vector.broadcast %31 : vector<1x1xf32> to vector<1x128xf32>
      %33 = arith.subf %29, %32 : vector<1x128xf32>
      %34 = math.exp %33 : vector<1x128xf32>
      %cst_27 = arith.constant dense<0.000000e+00> : vector<1xf32>
      %35 = vector.multi_reduction <add>, %34, %cst_27 [1] : vector<1x128xf32> to vector<1xf32>
      %36 = vector.shape_cast %35 : vector<1xf32> to vector<1x1xf32>
      %37 = vector.broadcast %36 : vector<1x1xf32> to vector<1x128xf32>
      %38 = arith.divf %34, %37 : vector<1x128xf32>
      %c0_28 = arith.constant 0 : index
      %c0_29 = arith.constant 0 : index
      %39 = vector.load %arg9[%c0_28, %c0_29] : memref<1x128xf32, #tpu.memory_space<vmem>>, vector<1x128xf32>
      tpu.vector_store %arg9[%c0_28, %c0_29], %38 {strides = array<i32>} : memref<1x128xf32, #tpu.memory_space<vmem>>, vector<1x128xf32>,
    } else {
    }
    return
  }
  func.func @transform_0(%arg0: i32, %arg1: i32) -> (i32, i32) {
    %c0_i32 = arith.constant 0 : i32
    return %arg0, %arg1 : i32, i32
  }
  func.func @transform_1(%arg0: i32, %arg1: i32) -> (i32, i32) {
    %c0_i32 = arith.constant 0 : i32
    %c0_i32_0 = arith.constant 0 : i32
    return %arg1, %c0_i32 : i32, i32
  }
  func.func @transform_2(%arg0: i32, %arg1: i32) -> (i32, i32) {
    %c0_i32 = arith.constant 0 : i32
    %c0_i32_0 = arith.constant 0 : i32
    %c0_i32_1 = arith.constant 0 : i32
    return %c0_i32, %c0_i32_0 : i32, i32
  }
  func.func @transform_3(%arg0: i32, %arg1: i32) -> (i32, i32) {
    %c0_i32 = arith.constant 0 : i32
    %c0_i32_0 = arith.constant 0 : i32
    %c0_i32_1 = arith.constant 0 : i32
    return %c0_i32, %c0_i32_0 : i32, i32
  }
  func.func @transform_4(%arg0: i32, %arg1: i32) -> (i32, i32) {
    %c0_i32 = arith.constant 0 : i32
    %c0_i32_0 = arith.constant 0 : i32
    %c0_i32_1 = arith.constant 0 : i32
    return %c0_i32, %c0_i32_0 : i32, i32
  }
  func.func @transform_5(%arg0: i32, %arg1: i32) -> (i32, i32) {
    %c0_i32 = arith.constant 0 : i32
    %c0_i32_0 = arith.constant 0 : i32
    %c0_i32_1 = arith.constant 0 : i32
    return %c0_i32, %c0_i32_0 : i32, i32
  }
  func.func @transform_6(%arg0: i32, %arg1: i32) -> (i32, i32) {
    %c0_i32 = arith.constant 0 : i32
    %c0_i32_0 = arith.constant 0 : i32
    %c0_i32_1 = arith.constant 0 : i32
    return %c0_i32, %c0_i32_0 : i32, i32
  }
  func.func @transform_7(%arg0: i32, %arg1: i32) -> (i32, i32) {
    %c0_i32 = arith.constant 0 : i32
    %c0_i32_0 = arith.constant 0 : i32
    return %arg0, %c0_i32 : i32, i32
  }
}

</mosaic_0001>

<bundles_post_ra>
// kernel: tpu_custom_call.1
= control target key start
LH: loop header
LB: loop body
LE: loop exit
PB: predicated region body
PF: predicated region fallthrough
CT: control target
= control target key end

     0   :  { %v389_v1 = vmov 0.0   ;;  %vm390_vm0 = vmmov 0   ;;  %vm32_vm1 = vcmask 516096   ;;  %s493_s0 = inlined_call_operand.vmem [shape: f32[1,64], index: 0, kind: input, shape index: {}]   ;;  %s494_s1 = inlined_call_operand.vmem [shape: bf16[64,64], index: 1, kind: input, shape index: {}]   ;;  %s495_s2 = inlined_call_operand.vmem [shape: f32[1,64], index: 2, kind: input, shape index: {}]   ;;  %s496_s3 = inlined_call_operand.vmem [shape: bf16[64,32], index: 3, kind: input, shape index: {}]   ;;  %s497_s4 = inlined_call_operand.vmem [shape: f32[1,32], index: 4, kind: input, shape index: {}]   ;;  %s498_s5 = inlined_call_operand.vmem [shape: bf16[32,128], index: 5, kind: input, shape index: {}]   ;;  %s499_s6 = inlined_call_operand.vmem [shape: f32[1,128], index: 6, kind: input, shape index: {}]   ;;  %s500_s7 = inlined_call_operand.hbm [shape: f32[1,128], index: 7, kind: output, shape index: {}]  }
   0x1   :  { %v351_v0 = vld [vmem:[%s494_s1] sm:$0xff]   ;;  %316 = vmatprep.subr.bf16.mxu0 %v389_v1  ;;  %328 = vmatprep.subr.bf16.mxu1 %v389_v1  ;;  %v352_v2 = vld [vmem:[%s494_s1 + $0x8] sm:$0xff]   ;;  %v353_v3 = vld [vmem:[%s494_s1 + $0x10] sm:$0xff]   ;;  %33 = vst.msk [vmem:[#allocation2] sm:$0x1] %vm32_vm1, %v389_v1 }
   0x2   :  { %317 = vmatpush3.bf16.msra.mxu0 %v351_v0  ;;  %324 = vmatprep.mubr.msk.bf16.mxu0 %vm390_vm0, %v389_v1 }
   0x3   :  { %318 = vmatprep.subr.bf16.mxu0 %v389_v1  ;;  %336 = vmatprep.mubr.msk.bf16.mxu1 %vm390_vm0, %v389_v1 }
   0x6   :  { %319 = vmatpush3.bf16.msra.mxu0 %v352_v2 }
   0x7   :  { %320 = vmatprep.subr.bf16.mxu0 %v389_v1 }
   0x8   :  { %12 = vsyncpa [#allocation4], 0  ;;  %v354_v4 = vld [vmem:[%s494_s1 + $0x18] sm:$0xff]   ;;  %v35_v5 = vld [vmem:[%s493_s0] sm:$0x1]  ;;  %vm69_vm2 = vcmask 523264  }
   0x9   :  { %v36_v6 = vpack.c.bf16 %v35_v5, %v35_v5  ;;  %v355_v7 = vld [vmem:[%s496_s3] sm:$0xff]   ;;  %v356_v8 = vld [vmem:[%s496_s3 + $0x8] sm:$0xff]   ;;  %v357_v9 = vld [vmem:[%s496_s3 + $0x10] sm:$0xff]   ;;  %vm219_vm3 = vcmask 261120   ;;  %vm263_vm4 = vcmask 1040384  }
   0xa   :  { %321 = vmatpush3.bf16.msra.mxu0 %v353_v3  ;;  %329 = vmatpush3.bf16.msra.mxu1 %v355_v7  ;;  %v358_v10 = vld [vmem:[%s496_s3 + $0x18] sm:$0xff]   ;;  %v359_v11 = vld [vmem:[%s498_s5] sm:$0xff]   ;;  %v360_v23 = vld [vmem:[%s498_s5 + $0x8] sm:$0xff]  }
   0xb   :  { %322 = vmatprep.subr.bf16.mxu0 %v389_v1  ;;  %330 = vmatprep.subr.bf16.mxu1 %v389_v1  ;;  %v34_v12 = vld [vmem:[#allocation2] sm:$0x1] }
   0xc   :  { %v120_v18 = vld [vmem:[%s495_s2] sm:$0x1] }
   0xd   :  { %v132_v24 = vld [vmem:[%s497_s4] sm:$0x1]  ;;  %s391_s4 = smov [#allocation3]  }
   0xe   :  { %323 = vmatpush3.bf16.msra.mxu0 %v354_v4  ;;  %331 = vmatpush3.bf16.msra.mxu1 %v356_v8  ;;  %v206_v32 = vld [vmem:[%s499_s6] sm:$0x1]  ;;  %s282_s5 = sshll.u32 %s391_s4, 4  ;;  %s283_s5 = int_to_ptr.vmem [resolvable:$true] %s282_s5 }
   0xf   :  { %340 = vmatprep.subr.bf16.mxu0 %v389_v1  ;;  %332 = vmatprep.subr.bf16.mxu1 %v389_v1  ;;  %s365_s6 = scalar_lea.vmem %s283_s5, 16  ;;  %s369_s25 = scalar_lea.vmem %s283_s5, 32 }
  0x10   :  { %p366_p0 = scmp.ne.s32.totalorder %s283_s5, %s365_s6  ;;  %p370_p1 = scmp.lt.s32.totalorder %s283_s5, %s283_s5 }
  0x11   :  { %325 = vmatmul.mubr.msk.bf16.vlgmr.msra.gmra.mrb[0].mxu0 %vm69_vm2, %v36_v6  ;;  %p371_p2 = scmp.lt.s32.totalorder %s369_s25, %s365_s6 }
  0x12   :  { %344 = vmatprep.mubr.msk.bf16.mxu0 %vm390_vm0, %v389_v1  ;;  %333 = vmatpush3.bf16.msra.mxu1 %v357_v9 }
  0x13   :  { %334 = vmatprep.subr.bf16.mxu1 %v389_v1  ;;  %341 = vmatpush3.bf16.msra.mxu0 %v359_v11  ;;  %p372_p3 = por %p371_p2, %p370_p1 }
  0x14   :  { %342 = vmatprep.subr.bf16.mxu0 %v389_v1 }
  0x15   :  { %p373_p4 = pnand %p372_p3, %p366_p0 }
  0x16   :  { %335 = vmatpush3.bf16.msra.mxu1 %v358_v10 }
  0x17   :  { %343 = vmatpush3.bf16.msra.mxu0 %v360_v23 }
  0xe4   :  { %v107_v13 = vpop.f32.mrb[0].mxu0 }
  0xe5   :  { %v113_v14 = vadd.f32 %v107_v13, %v34_v12  ;;  %v326_v15 = vpop.f32.mrb[1].mxu0 }
  0xe6   :  { %v110_v16 = vpop.f32.mrb[2].mxu0 }
  0xe7   :  { %115 = vst.msk [vmem:[#allocation2] sm:$0x1] %vm32_vm1, %v113_v14  ;;  %v327_v17 = vpop.f32.mrb[3].mxu0 }
  0xee   :  { %v119_v19 = vld [vmem:[#allocation2] sm:$0x1] }
  0xef   :  { %v121_v20 = vadd.f32 %v120_v18, %v119_v19 }
  0xf1   :  { %v122_v21 = vmax.f32 %v121_v20, 0.0 }
  0xf3   :  { %v123_v22 = vpack.c.bf16 %v122_v21, %v122_v21 }
  0xf5   :  { %337 = vmatmul.mubr.msk.bf16.vlgmr.msra.gmra.mrb[0].mxu1 %vm69_vm2, %v123_v22 }
 0x1c8   :  { %v194_v25 = vpop.f32.mrb[0].mxu1 }
 0x1c9   :  { %v195_v26 = vadd.f32 %v194_v25, %v132_v24  ;;  %v338_v27 = vpop.f32.mrb[1].mxu1 }
 0x1ca   :  { %v197_v28 = vpop.f32.mrb[2].mxu1 }
 0x1cb   :  { %v200_v29 = vmax.f32 %v195_v26, 0.0  ;;  %v339_v30 = vpop.f32.mrb[3].mxu1 }
 0x1cd   :  { %v201_v31 = vpack.c.bf16 %v200_v29, %v200_v29 }
 0x1cf   :  { %345 = vmatmul.mubr.msk.bf16.vlgmr.msra.gmra.mrb[4].mxu0 %vm219_vm3, %v201_v31 }
 0x2a2   :  { %v257_v33 = vpop.f32.mrb[4].mxu0 }
 0x2a3   :  { %v258_v34 = vadd.f32 %v257_v33, %v206_v32  ;;  %v346_v35 = vpop.f32.mrb[5].mxu0 }
 0x2a4   :  { %v260_v36 = vpop.f32.mrb[6].mxu0 }
 0x2a5   :  { %v347_v37 = vpop.f32.mrb[7].mxu0  ;;  %v264_v38 = vsel %vm263_vm4, %v258_v34, -inf }
 0x2a6   :  { %265 = vmax.xlane.f32.xlu0 %v264_v38 }
 0x333   :  { %v266_v39 = vpop.xlane.xlu0 %265 }
 0x334   :  { %v267_v40 = vsub.f32 %v258_v34, %v266_v39 }
 0x336   :  { %v268_v41 = vmul.f32 1.442695, %v267_v40 }
 0x338   :  { %361 = vpow2.f32 %v268_v41 }
 0x342   :  { %v362_v42 = vpop.eup %361 }
 0x343   :  { %v270_v43 = vsel %vm263_vm4, %v362_v42, 0.0 }
 0x344   :  { %271 = vadd.xlane.f32.xlu0 %v270_v43 }
 0x3d1   :  { %v272_v44 = vpop.xlane.xlu0 %271 }
 0x3d2   :  { %363 = vrcp.f32 %v272_v44 }
 0x3dc   :  { %v364_v45 = vpop.eup %363 }
 0x3dd   :  { %v274_v46 = vmul.f32 %v364_v45, %v362_v42 }
 0x3df   :  { %275 = vst [vmem:[#allocation3] sm:$0x1] %v274_v46 }
 0x3e0   :  { %376 = shalt.err (!%p373_p4)
}
 0x3e1   :  { %s377_s28 = scalar_lea.hbm %s500_s7, 16 }
 0x3e2   :  { %p378_p5 = scmp.ne.s32.totalorder %s500_s7, %s377_s28  ;;  %p381_p6 = scmp.lt.u32.totalorder %s377_s28, %s500_s7 }
 0x3e4   :  { %p383_p7 = pnand %p381_p6, %p378_p5 }
 0x3e6   :  { %386 = shalt.err (!%p383_p7)
}
 0x3e7   :  { %285 = dma.vmem_to_hbm [thread:$0]  %s283_s5, 16, %s500_s7, [#allocation4]  }
 0x3e8   :  { %387 = dma.done.wait [#allocation4], 16  }
 0x3e9   :  { %388 = vsyncadd [#allocation4], 4294967280 }
 0x3ea   :  { %289 = vsyncpa [#allocation4], 1 }

</bundles_post_ra>
